<compile_context>
chip_gen: v5e
topology: v5e:2x2
jax: 0.10.0
libtpu: 0.0.40
codegen_flags: <defaults>
</compile_context>

<pallas_src>
import functools

import jax
import jax.numpy as jnp
from jax.experimental import pallas as pl
from jax.experimental.pallas import tpu as pltpu  # noqa: F401  (TPU backend / params)


# ----------------------------- fused Pallas kernel ---------------------------

def _net_fused_kernel(a_ref, x_ref, w0_ref, b0_ref, wr_ref, br_ref, mask_ref,
                      fc1w_ref, fc1b_ref, fc2w_ref, fc2b_ref, fc3w_ref, fc3b_ref,
                      o_ref, *, num_layers):
    """Entire Net.forward in one kernel; everything stays resident in VMEM/vregs."""
    a = a_ref[...]                                   # A_hat, loaded once, reused by all layers

    # ---- layer 0 : y1 = relu(A_hat @ (x @ W0) + b0)   (no residual) ----
    xw = jnp.dot(x_ref[...], w0_ref[...], preferred_element_type=jnp.float32)
    y1 = jnp.maximum(jnp.dot(a, xw, preferred_element_type=jnp.float32) + b0_ref[...], 0.0)
    y = mask_ref[0] * y1                             # bernoulli row-mask (applied in train & eval)

    # ---- layers 1..L-1 : y = mask_i * relu(A_hat @ (y @ Wi) + bi + y1) ----
    # (mask_i is all-ones where the reference applies no mask; y1 is the layer-0 output)
    for i in range(1, num_layers):
        xw = jnp.dot(y, wr_ref[i - 1], preferred_element_type=jnp.float32)
        yi = jnp.maximum(
            jnp.dot(a, xw, preferred_element_type=jnp.float32) + br_ref[i - 1] + y1, 0.0)
        y = mask_ref[i] * yi

    # ---- fc1 -> relu -> fc2 -> relu -> fc3 -> log_softmax ----
    h = jnp.maximum(
        jnp.dot(y, fc1w_ref[...], preferred_element_type=jnp.float32) + fc1b_ref[...], 0.0)
    h = jnp.maximum(
        jnp.dot(h, fc2w_ref[...], preferred_element_type=jnp.float32) + fc2b_ref[...], 0.0)
    logits = jnp.dot(h, fc3w_ref[...], preferred_element_type=jnp.float32) + fc3b_ref[...]

    m = jnp.max(logits, axis=1, keepdims=True)
    s = logits - m
    lse = jnp.log(jnp.sum(jnp.exp(s), axis=1, keepdims=True))
    o_ref[...] = s - lse


# ----------------------------- pallas_call wrapper ----------------------------

def _full_spec(shape):
    # whole array as a single VMEM block (shapes here are tiny: total working set << 1 MiB)
    return pl.BlockSpec(shape, lambda: (0,) * len(shape))


def net_fused_call(a_hat, x, w0, b0, wr, br, masks,
                   fc1w, fc1b, fc2w, fc2b, fc3w, fc3b, *, num_layers):
    n = x.shape[0]
    c = fc3w.shape[1]
    inputs = (a_hat, x, w0, b0, wr, br, masks, fc1w, fc1b, fc2w, fc2b, fc3w, fc3b)
    kernel = functools.partial(_net_fused_kernel, num_layers=num_layers)
    return pl.pallas_call(
        kernel,
        out_shape=jax.ShapeDtypeStruct((n, c), jnp.float32),
        in_specs=[_full_spec(t.shape) for t in inputs],
        out_specs=_full_spec((n, c)),
    )(*inputs)


# ----------------------------- Net forward (glue) -----------------------------

@functools.partial(jax.jit, static_argnames=("train",))
def net_forward(params, a_hat, x, *, train, dr, key):
    """Mirrors Net.forward(TRAIN) from FAD_Node.py (GCNConv variant), fully fused."""
    n = x.shape[0]
    gcn = params["gcn"]
    num_layers = len(gcn)
    keys = jax.random.split(key, num_layers)

    # Per-layer (N,1) row masks. The reference applies the bernoulli mask at layer 0
    # in BOTH train and eval, and additionally at layers with i % 8 % 4 == 0 in train.
    mask_cols = []
    for i in range(num_layers):
        apply_mask = (i == 0) or (train and (i % 8 % 4 == 0))
        if apply_mask:
            m = jax.random.bernoulli(keys[i], 1.0 - dr, (n, 1)).astype(jnp.float32)
        else:
            m = jnp.ones((n, 1), jnp.float32)
        mask_cols.append(m)
    masks = jnp.stack(mask_cols, axis=0)                         # (L, N, 1)

    w0, b0 = gcn[0]
    if num_layers > 1:
        wr = jnp.stack([w for w, _ in gcn[1:]], axis=0)          # (L-1, H, H)
        br = jnp.stack([b for _, b in gcn[1:]], axis=0)          # (L-1, 1, H)
    else:
        h = w0.shape[1]
        wr = jnp.zeros((1, h, h), jnp.float32)                   # unused placeholder
        br = jnp.zeros((1, 1, h), jnp.float32)

    fc1w, fc1b = params["fc1"]
    fc2w, fc2b = params["fc2"]
    fc3w, fc3b = params["fc3"]

    return net_fused_call(a_hat, x, w0, b0, wr, br, masks,
                          fc1w, fc1b, fc2w, fc2b, fc3w, fc3b,
                          num_layers=num_layers)


# ----------------------------- setup helpers ----------------------------------

def make_norm_adjacency(key, n, avg_degree=4):
    """Dense D^{-1/2} (A + I) D^{-1/2} with a random symmetric A (GCNConv normalization)."""
    p = avg_degree / n
    a = (jax.random.uniform(key, (n, n)) < p).astype(jnp.float32)
    a = jnp.maximum(a, a.T)                       # symmetrize (undirected edges)
    a = a * (1.0 - jnp.eye(n)) + jnp.eye(n)       # add self loops
    deg = jnp.sum(a, axis=1)
    d_inv_sqrt = 1.0 / jnp.sqrt(deg)
    return a * d_inv_sqrt[:, None] * d_inv_sqrt[None, :]


def init_params(key, n_features, num_hidden, num_classes, num_layers):
    params = {"gcn": []}
    k = key
    for i in range(num_layers):
        k, kw, kb = jax.random.split(k, 3)
        fin = n_features if i == 0 else num_hidden
        w = 0.1 * jax.random.normal(kw, (fin, num_hidden), jnp.float32)
        b = 0.1 * jax.random.normal(kb, (1, num_hidden), jnp.float32)
        params["gcn"].append((w, b))
    for name, (fin, fout) in (("fc1", (num_hidden, num_hidden)),
                              ("fc2", (num_hidden, num_hidden)),
                              ("fc3", (num_hidden, num_classes))):
        k, kw, kb = jax.random.split(k, 3)
        params[name] = (0.1 * jax.random.normal(kw, (fin, fout), jnp.float32),
                        0.1 * jax.random.normal(kb, (1, fout), jnp.float32))
    return params


# ----------------------------- main --------------------------------------------

if __name__ == "__main__":
    # small, Cora-like synthetic setup
    N_NODES = 64
    N_FEATURES = 32      # dataset.num_node_features (synthetic)
    NUM_HIDDEN = 32
    NUM_CLASSES = 7      # dataset.num_classes for Cora
    NUM_LAYERS = 3
    DR = 0.5

    root = jax.random.PRNGKey(0)
    k_adj, k_x, k_params, k_drop_train, k_drop_eval = jax.random.split(root, 5)

    a_hat = make_norm_adjacency(k_adj, N_NODES)
    x = jax.random.normal(k_x, (N_NODES, N_FEATURES), jnp.float32)
    params = init_params(k_params, N_FEATURES, NUM_HIDDEN, NUM_CLASSES, NUM_LAYERS)

    out_train = net_forward(params, a_hat, x, train=True, dr=DR, key=k_drop_train)
    out_eval = net_forward(params, a_hat, x, train=False, dr=DR, key=k_drop_eval)
    jax.block_until_ready(out_train)
    jax.block_until_ready(out_eval)

    assert out_train.shape == (N_NODES, NUM_CLASSES)
    assert out_eval.shape == (N_NODES, NUM_CLASSES)
    # rows of log_softmax must (log-)normalize to ~1
    assert jnp.allclose(jnp.sum(jnp.exp(out_eval), axis=1), 1.0, atol=1e-4)
    assert jnp.allclose(jnp.sum(jnp.exp(out_train), axis=1), 1.0, atol=1e-4)
    assert bool(jnp.all(jnp.isfinite(out_train))) and bool(jnp.all(jnp.isfinite(out_eval)))

    print("KERNEL_OK")
</pallas_src>

<mosaic_0001>
module attributes {stable_mosaic.version = 11 : i64} {
  func.func @_net_fused_kernel(%arg0: memref<64x64xf32, #tpu.memory_space<vmem>>, %arg1: memref<64x32xf32, #tpu.memory_space<vmem>>, %arg2: memref<32x32xf32, #tpu.memory_space<vmem>>, %arg3: memref<1x32xf32, #tpu.memory_space<vmem>>, %arg4: memref<2x32x32xf32, #tpu.memory_space<vmem>>, %arg5: memref<2x1x32xf32, #tpu.memory_space<vmem>>, %arg6: memref<3x64x1xf32, #tpu.memory_space<vmem>>, %arg7: memref<32x32xf32, #tpu.memory_space<vmem>>, %arg8: memref<1x32xf32, #tpu.memory_space<vmem>>, %arg9: memref<32x32xf32, #tpu.memory_space<vmem>>, %arg10: memref<1x32xf32, #tpu.memory_space<vmem>>, %arg11: memref<32x7xf32, #tpu.memory_space<vmem>>, %arg12: memref<1x7xf32, #tpu.memory_space<vmem>>, %arg13: memref<64x7xf32, #tpu.memory_space<vmem>>) attributes {dimension_semantics = [], scalar_prefetch = 0 : i64, scratch_operands = 0 : i64, tpu.core_type = #tpu.core_type<tc>} {
    %c0 = arith.constant 0 : index
    %c0_0 = arith.constant 0 : index
    %0 = vector.load %arg0[%c0, %c0_0] : memref<64x64xf32, #tpu.memory_space<vmem>>, vector<64x64xf32>
    %c0_1 = arith.constant 0 : index
    %c0_2 = arith.constant 0 : index
    %1 = vector.load %arg1[%c0_1, %c0_2] : memref<64x32xf32, #tpu.memory_space<vmem>>, vector<64x32xf32>
    %c0_3 = arith.constant 0 : index
    %c0_4 = arith.constant 0 : index
    %2 = vector.load %arg2[%c0_3, %c0_4] : memref<32x32xf32, #tpu.memory_space<vmem>>, vector<32x32xf32>
    %cst = arith.constant dense<0.000000e+00> : vector<64x32xf32>
    %3 = tpu.matmul %1, %2, %cst {dimension_numbers = #tpu.dot_dimension_numbers<[1], [0], [0], [1], [0, 0, 1, 1], [], []>} : vector<64x32xf32>, vector<32x32xf32>, vector<64x32xf32> -> vector<64x32xf32>
    %cst_5 = arith.constant dense<0.000000e+00> : vector<64x32xf32>
    %4 = tpu.matmul %0, %3, %cst_5 {dimension_numbers = #tpu.dot_dimension_numbers<[1], [0], [0], [1], [0, 0, 1, 1], [], []>} : vector<64x64xf32>, vector<64x32xf32>, vector<64x32xf32> -> vector<64x32xf32>
    %c0_6 = arith.constant 0 : index
    %c0_7 = arith.constant 0 : index
    %5 = vector.load %arg3[%c0_6, %c0_7] : memref<1x32xf32, #tpu.memory_space<vmem>>, vector<1x32xf32>
    %6 = vector.broadcast %5 : vector<1x32xf32> to vector<64x32xf32>
    %7 = arith.addf %4, %6 : vector<64x32xf32>
    %cst_8 = arith.constant 0.000000e+00 : f32
    %8 = vector.broadcast %cst_8 : f32 to vector<64x32xf32>
    %9 = arith.maximumf %7, %8 : vector<64x32xf32>
    %c0_9 = arith.constant 0 : index
    %c0_10 = arith.constant 0 : index
    %c0_11 = arith.constant 0 : index
    %10 = vector.load %arg6[%c0_9, %c0_10, %c0_11] : memref<3x64x1xf32, #tpu.memory_space<vmem>>, vector<1x64x1xf32>
    %11 = vector.shape_cast %10 : vector<1x64x1xf32> to vector<64x1xf32>
    %12 = vector.broadcast %11 : vector<64x1xf32> to vector<64x32xf32>
    %13 = arith.mulf %12, %9 : vector<64x32xf32>
    %c0_12 = arith.constant 0 : index
    %c0_13 = arith.constant 0 : index
    %c0_14 = arith.constant 0 : index
    %14 = vector.load %arg4[%c0_12, %c0_13, %c0_14] : memref<2x32x32xf32, #tpu.memory_space<vmem>>, vector<1x32x32xf32>
    %15 = vector.shape_cast %14 : vector<1x32x32xf32> to vector<32x32xf32>
    %cst_15 = arith.constant dense<0.000000e+00> : vector<64x32xf32>
    %16 = tpu.matmul %13, %15, %cst_15 {dimension_numbers = #tpu.dot_dimension_numbers<[1], [0], [0], [1], [0, 0, 1, 1], [], []>} : vector<64x32xf32>, vector<32x32xf32>, vector<64x32xf32> -> vector<64x32xf32>
    %cst_16 = arith.constant dense<0.000000e+00> : vector<64x32xf32>
    %17 = tpu.matmul %0, %16, %cst_16 {dimension_numbers = #tpu.dot_dimension_numbers<[1], [0], [0], [1], [0, 0, 1, 1], [], []>} : vector<64x64xf32>, vector<64x32xf32>, vector<64x32xf32> -> vector<64x32xf32>
    %c0_17 = arith.constant 0 : index
    %c0_18 = arith.constant 0 : index
    %c0_19 = arith.constant 0 : index
    %18 = vector.load %arg5[%c0_17, %c0_18, %c0_19] : memref<2x1x32xf32, #tpu.memory_space<vmem>>, vector<1x1x32xf32>
    %19 = vector.shape_cast %18 : vector<1x1x32xf32> to vector<1x32xf32>
    %20 = vector.broadcast %19 : vector<1x32xf32> to vector<64x32xf32>
    %21 = arith.addf %17, %20 : vector<64x32xf32>
    %22 = arith.addf %21, %9 : vector<64x32xf32>
    %cst_20 = arith.constant 0.000000e+00 : f32
    %23 = vector.broadcast %cst_20 : f32 to vector<64x32xf32>
    %24 = arith.maximumf %22, %23 : vector<64x32xf32>
    %c1 = arith.constant 1 : index
    %c0_21 = arith.constant 0 : index
    %c0_22 = arith.constant 0 : index
    %25 = vector.load %arg6[%c1, %c0_21, %c0_22] : memref<3x64x1xf32, #tpu.memory_space<vmem>>, vector<1x64x1xf32>
    %26 = vector.shape_cast %25 : vector<1x64x1xf32> to vector<64x1xf32>
    %27 = vector.broadcast %26 : vector<64x1xf32> to vector<64x32xf32>
    %28 = arith.mulf %27, %24 : vector<64x32xf32>
    %c1_23 = arith.constant 1 : index
    %c0_24 = arith.constant 0 : index
    %c0_25 = arith.constant 0 : index
    %29 = vector.load %arg4[%c1_23, %c0_24, %c0_25] : memref<2x32x32xf32, #tpu.memory_space<vmem>>, vector<1x32x32xf32>
    %30 = vector.shape_cast %29 : vector<1x32x32xf32> to vector<32x32xf32>
    %cst_26 = arith.constant dense<0.000000e+00> : vector<64x32xf32>
    %31 = tpu.matmul %28, %30, %cst_26 {dimension_numbers = #tpu.dot_dimension_numbers<[1], [0], [0], [1], [0, 0, 1, 1], [], []>} : vector<64x32xf32>, vector<32x32xf32>, vector<64x32xf32> -> vector<64x32xf32>
    %cst_27 = arith.constant dense<0.000000e+00> : vector<64x32xf32>
    %32 = tpu.matmul %0, %31, %cst_27 {dimension_numbers = #tpu.dot_dimension_numbers<[1], [0], [0], [1], [0, 0, 1, 1], [], []>} : vector<64x64xf32>, vector<64x32xf32>, vector<64x32xf32> -> vector<64x32xf32>
    %c1_28 = arith.constant 1 : index
    %c0_29 = arith.constant 0 : index
    %c0_30 = arith.constant 0 : index
    %33 = vector.load %arg5[%c1_28, %c0_29, %c0_30] : memref<2x1x32xf32, #tpu.memory_space<vmem>>, vector<1x1x32xf32>
    %34 = vector.shape_cast %33 : vector<1x1x32xf32> to vector<1x32xf32>
    %35 = vector.broadcast %34 : vector<1x32xf32> to vector<64x32xf32>
    %36 = arith.addf %32, %35 : vector<64x32xf32>
    %37 = arith.addf %36, %9 : vector<64x32xf32>
    %cst_31 = arith.constant 0.000000e+00 : f32
    %38 = vector.broadcast %cst_31 : f32 to vector<64x32xf32>
    %39 = arith.maximumf %37, %38 : vector<64x32xf32>
    %c2 = arith.constant 2 : index
    %c0_32 = arith.constant 0 : index
    %c0_33 = arith.constant 0 : index
    %40 = vector.load %arg6[%c2, %c0_32, %c0_33] : memref<3x64x1xf32, #tpu.memory_space<vmem>>, vector<1x64x1xf32>
    %41 = vector.shape_cast %40 : vector<1x64x1xf32> to vector<64x1xf32>
    %42 = vector.broadcast %41 : vector<64x1xf32> to vector<64x32xf32>
    %43 = arith.mulf %42, %39 : vector<64x32xf32>
    %c0_34 = arith.constant 0 : index
    %c0_35 = arith.constant 0 : index
    %44 = vector.load %arg7[%c0_34, %c0_35] : memref<32x32xf32, #tpu.memory_space<vmem>>, vector<32x32xf32>
    %cst_36 = arith.constant dense<0.000000e+00> : vector<64x32xf32>
    %45 = tpu.matmul %43, %44, %cst_36 {dimension_numbers = #tpu.dot_dimension_numbers<[1], [0], [0], [1], [0, 0, 1, 1], [], []>} : vector<64x32xf32>, vector<32x32xf32>, vector<64x32xf32> -> vector<64x32xf32>
    %c0_37 = arith.constant 0 : index
    %c0_38 = arith.constant 0 : index
    %46 = vector.load %arg8[%c0_37, %c0_38] : memref<1x32xf32, #tpu.memory_space<vmem>>, vector<1x32xf32>
    %47 = vector.broadcast %46 : vector<1x32xf32> to vector<64x32xf32>
    %48 = arith.addf %45, %47 : vector<64x32xf32>
    %cst_39 = arith.constant 0.000000e+00 : f32
    %49 = vector.broadcast %cst_39 : f32 to vector<64x32xf32>
    %50 = arith.maximumf %48, %49 : vector<64x32xf32>
    %c0_40 = arith.constant 0 : index
    %c0_41 = arith.constant 0 : index
    %51 = vector.load %arg9[%c0_40, %c0_41] : memref<32x32xf32, #tpu.memory_space<vmem>>, vector<32x32xf32>
    %cst_42 = arith.constant dense<0.000000e+00> : vector<64x32xf32>
    %52 = tpu.matmul %50, %51, %cst_42 {dimension_numbers = #tpu.dot_dimension_numbers<[1], [0], [0], [1], [0, 0, 1, 1], [], []>} : vector<64x32xf32>, vector<32x32xf32>, vector<64x32xf32> -> vector<64x32xf32>
    %c0_43 = arith.constant 0 : index
    %c0_44 = arith.constant 0 : index
    %53 = vector.load %arg10[%c0_43, %c0_44] : memref<1x32xf32, #tpu.memory_space<vmem>>, vector<1x32xf32>
    %54 = vector.broadcast %53 : vector<1x32xf32> to vector<64x32xf32>
    %55 = arith.addf %52, %54 : vector<64x32xf32>
    %cst_45 = arith.constant 0.000000e+00 : f32
    %56 = vector.broadcast %cst_45 : f32 to vector<64x32xf32>
    %57 = arith.maximumf %55, %56 : vector<64x32xf32>
    %c0_46 = arith.constant 0 : index
    %c0_47 = arith.constant 0 : index
    %58 = vector.load %arg11[%c0_46, %c0_47] : memref<32x7xf32, #tpu.memory_space<vmem>>, vector<32x7xf32>
    %cst_48 = arith.constant dense<0.000000e+00> : vector<64x7xf32>
    %59 = tpu.matmul %57, %58, %cst_48 {dimension_numbers = #tpu.dot_dimension_numbers<[1], [0], [0], [1], [0, 0, 1, 1], [], []>} : vector<64x32xf32>, vector<32x7xf32>, vector<64x7xf32> -> vector<64x7xf32>
    %c0_49 = arith.constant 0 : index
    %c0_50 = arith.constant 0 : index
    %60 = vector.load %arg12[%c0_49, %c0_50] : memref<1x7xf32, #tpu.memory_space<vmem>>, vector<1x7xf32>
    %61 = vector.broadcast %60 : vector<1x7xf32> to vector<64x7xf32>
    %62 = arith.addf %59, %61 : vector<64x7xf32>
    %cst_51 = arith.constant dense<0xFF800000> : vector<64xf32>
    %63 = vector.multi_reduction <maximumf>, %62, %cst_51 [1] : vector<64x7xf32> to vector<64xf32>
    %64 = vector.shape_cast %63 : vector<64xf32> to vector<64x1xf32>
    %65 = vector.broadcast %64 : vector<64x1xf32> to vector<64x7xf32>
    %66 = arith.subf %62, %65 : vector<64x7xf32>
    %67 = math.exp %66 : vector<64x7xf32>
    %cst_52 = arith.constant dense<0.000000e+00> : vector<64xf32>
    %68 = vector.multi_reduction <add>, %67, %cst_52 [1] : vector<64x7xf32> to vector<64xf32>
    %69 = vector.shape_cast %68 : vector<64xf32> to vector<64x1xf32>
    %70 = math.log %69 : vector<64x1xf32>
    %71 = vector.broadcast %70 : vector<64x1xf32> to vector<64x7xf32>
    %72 = arith.subf %66, %71 : vector<64x7xf32>
    %c0_53 = arith.constant 0 : index
    %c0_54 = arith.constant 0 : index
    %73 = vector.load %arg13[%c0_53, %c0_54] : memref<64x7xf32, #tpu.memory_space<vmem>>, vector<64x7xf32>
    tpu.vector_store %arg13[%c0_53, %c0_54], %72 {strides = array<i32>} : memref<64x7xf32, #tpu.memory_space<vmem>>, vector<64x7xf32>,
    return
  }
}

</mosaic_0001>

<bundles_post_ra>
// kernel: net_forward.3
= control target key start
LH: loop header
LB: loop body
LE: loop exit
PB: predicated region body
PF: predicated region fallthrough
CT: control target
= control target key end

     0   :  { %v1131_v2 = vmov 0   ;;  %vm64_vm0 = vcmask 261120   ;;  %vm134_vm1 = vcmask 523264   ;;  %vm875_vm2 = vcmask 56320   ;;  %s1632_s2 = inlined_call_operand.vmem [shape: f32[32,32], index: 2, kind: input, shape index: {}]   ;;  %s1633_s1 = inlined_call_operand.vmem [shape: f32[64,32], index: 1, kind: input, shape index: {}]   ;;  %s1634_s6 = inlined_call_operand.vmem [shape: f32[3,64,1], index: 6, kind: input, shape index: {}]   ;;  %s1635_s3 = inlined_call_operand.vmem [shape: f32[1,32], index: 3, kind: input, shape index: {}]   ;;  %s1636_s0 = inlined_call_operand.vmem [shape: f32[64,64], index: 0, kind: input, shape index: {}]   ;;  %s1637_s4 = inlined_call_operand.vmem [shape: f32[2,32,32], index: 4, kind: input, shape index: {}]   ;;  %s1638_s5 = inlined_call_operand.vmem [shape: f32[2,1,32], index: 5, kind: input, shape index: {}]   ;;  %s1639_s7 = inlined_call_operand.vmem [shape: f32[32,32], index: 7, kind: input, shape index: {}]   ;;  %s1640_s8 = inlined_call_operand.vmem [shape: f32[1,32], index: 8, kind: input, shape index: {}]   ;;  %s1641_s9 = inlined_call_operand.vmem [shape: f32[32,32], index: 9, kind: input, shape index: {}]   ;;  %s1642_s10 = inlined_call_operand.vmem [shape: f32[1,32], index: 10, kind: input, shape index: {}]   ;;  %s1643_s11 = inlined_call_operand.vmem [shape: f32[32,7], index: 11, kind: input, shape index: {}]   ;;  %s1644_s12 = inlined_call_operand.vmem [shape: f32[1,7], index: 12, kind: input, shape index: {}]   ;;  %s1645_s13 = inlined_call_operand.vmem [shape: f32[64,7], index: 13, kind: output, shape index: {}]  }
   0x1   :  { %v63_v0 = vld [vmem:[%s1632_s2 + $0x18] sm:$0xff]  ;;  %v62_v1 = vld [vmem:[%s1632_s2 + $0x10] sm:$0xff]  ;;  %1090 = vset.pattern.permute.xlu0 %v1131_v2  ;;  %1091 = vset.pattern.permute.xlu1 %v1131_v2  ;;  %v61_v3 = vld [vmem:[%s1632_s2 + $0x8] sm:$0xff] }
   0x2   :  { %1079 = vmatpush.msra.mxu3 %v63_v0  ;;  %1078 = vmatpush.msra.mxu2 %v63_v0  ;;  %v60_v4 = vld [vmem:[%s1632_s2] sm:$0xff]  ;;  %v58_v5 = vld [vmem:[%s1633_s1 + $0x30] sm:$0xff]  ;;  %v59_v11 = vld [vmem:[%s1633_s1 + $0x38] sm:$0xff] }
   0x3   :  { %1077 = vmatpush.msra.mxu1 %v63_v0  ;;  %101 = vmatpush.msra.mxu0 %v63_v0  ;;  %v56_v6 = vld [vmem:[%s1633_s1 + $0x20] sm:$0xff]  ;;  %v54_v7 = vld [vmem:[%s1633_s1 + $0x10] sm:$0xff]  ;;  %v57_v12 = vld [vmem:[%s1633_s1 + $0x28] sm:$0xff] }
   0x4   :  { %1082 = vmatpush.msra.mxu3 %v62_v1  ;;  %1081 = vmatpush.msra.mxu2 %v62_v1  ;;  %v52_v8 = vld [vmem:[%s1633_s1] sm:$0xff]  ;;  %v210_v10 = vld [vmem:[%s1634_s6 + $0x10] sm:$0xff]  ;;  %v55_v13 = vld [vmem:[%s1633_s1 + $0x18] sm:$0xff] }
   0x5   :  { %1080 = vmatpush.msra.mxu1 %v62_v1  ;;  %102 = vmatpush.msra.mxu0 %v62_v1  ;;  %v208_v9 = vld [vmem:[%s1634_s6] sm:$0xff]  ;;  %v53_v14 = vld [vmem:[%s1633_s1 + $0x8] sm:$0xff]  ;;  %v214_v16 = vld [vmem:[%s1634_s6 + $0x30] sm:$0xff] }
   0x6   :  { %1085 = vmatpush.msra.mxu3 %v61_v3  ;;  %1084 = vmatpush.msra.mxu2 %v61_v3  ;;  %v209_v15 = vld [vmem:[%s1634_s6 + $0x8] sm:$0xff]  ;;  %v211_v17 = vld [vmem:[%s1634_s6 + $0x18] sm:$0xff]  ;;  %v1020_v20 = vld [vmem:[%s1634_s6 + $0x60] sm:$0xff] }
   0x7   :  { %1083 = vmatpush.msra.mxu1 %v61_v3  ;;  %103 = vmatpush.msra.mxu0 %v61_v3  ;;  %v1017_v18 = vld [vmem:[%s1634_s6 + $0x48] sm:$0xff]  ;;  %v215_v19 = vld [vmem:[%s1634_s6 + $0x38] sm:$0xff]  ;;  %v1018_v21 = vld [vmem:[%s1634_s6 + $0x50] sm:$0xff] }
   0x8   :  { %1088 = vmatpush.msra.mxu3 %v60_v4  ;;  %1087 = vmatpush.msra.mxu2 %v60_v4  ;;  %v1023_v22 = vld [vmem:[%s1634_s6 + $0x78] sm:$0xff]  ;;  %v1021_v23 = vld [vmem:[%s1634_s6 + $0x68] sm:$0xff]  ;;  %v1047_v24 = vld [vmem:[%s1634_s6 + $0x90] sm:$0xff] }
   0x9   :  { %990 = vmatmul.msk.f32.vlgmr.msra.gmra.mxu3 %vm64_vm0, %v58_v5  ;;  %988 = vmatmul.msk.f32.vlgmr.msra.gmra.mxu2 %vm64_vm0, %v56_v6  ;;  %v212_v27 = vld [vmem:[%s1634_s6 + $0x20] sm:$0xff]  ;;  %v1050_v29 = vld [vmem:[%s1634_s6 + $0xa8] sm:$0xff]  ;;  %v1048_v35 = vld [vmem:[%s1634_s6 + $0x98] sm:$0xff] }
   0xa   :  { %1086 = vmatpush.msra.mxu1 %v60_v4  ;;  %104 = vmatpush.msra.mxu0 %v60_v4  ;;  %v1045_v28 = vld [vmem:[%s1634_s6 + $0x80] sm:$0xff]  ;;  %v213_v33 = vld [vmem:[%s1634_s6 + $0x28] sm:$0xff]  ;;  %v1051_v39 = vld [vmem:[%s1634_s6 + $0xb0] sm:$0xff] }
   0xb   :  { %986 = vmatmul.msk.f32.vlgmr.msra.gmra.mxu1 %vm64_vm0, %v54_v7  ;;  %984 = vmatmul.msk.f32.vlgmr.msra.gmra.mxu0 %vm64_vm0, %v52_v8  ;;  %v1016_v37 = vld [vmem:[%s1634_s6 + $0x40] sm:$0xff]  ;;  %v1019_v41 = vld [vmem:[%s1634_s6 + $0x58] sm:$0xff]  ;;  %v1316_v42 = vld [vmem:[%s1636_s0 + $0x8] sm:$0xff] }
   0xc   :  { %218 = vperm.xlu0 %1090, %v208_v9   ;;  %228 = vperm.xlu1 %1091, %v210_v10   ;;  %v1306_v40 = vld [vmem:[%s1636_s0] sm:$0xff]  ;;  %v1022_v43 = vld [vmem:[%s1634_s6 + $0x70] sm:$0xff]  ;;  %v1046_v45 = vld [vmem:[%s1634_s6 + $0x88] sm:$0xff] }
   0xd   :  { %1092 = vset.pattern.permute.xlu2 %v1131_v2  ;;  %v1326_v44 = vld [vmem:[%s1636_s0 + $0x10] sm:$0xff]  ;;  %v1336_v46 = vld [vmem:[%s1636_s0 + $0x18] sm:$0xff]  ;;  %v1049_v47 = vld [vmem:[%s1634_s6 + $0xa0] sm:$0xff] }
   0xe   :  { %238 = vperm.xlu2 %1092, %v212_v27   ;;  %v1346_v48 = vld [vmem:[%s1636_s0 + $0x20] sm:$0xff]  ;;  %v1052_v49 = vld [vmem:[%s1634_s6 + $0xb8] sm:$0xff]  ;;  %v1356_v50 = vld [vmem:[%s1636_s0 + $0x28] sm:$0xff] }
   0xf   :  { %v1363_v51 = vld [vmem:[%s1636_s0 + $0x30] sm:$0xff]  ;;  %v1370_v52 = vld [vmem:[%s1636_s0 + $0x38] sm:$0xff]  ;;  %v265_v55 = vld [vmem:[%s1637_s4 + $0x8] sm:$0xff] }
  0x10   :  { %v267_v53 = vld [vmem:[%s1637_s4 + $0x18] sm:$0xff]  ;;  %v266_v54 = vld [vmem:[%s1637_s4 + $0x10] sm:$0xff]  ;;  %v264_v56 = vld [vmem:[%s1637_s4] sm:$0xff] }
  0x11   :  { %991 = vmatmul.msk.f32.gmra.mxu3 %vm64_vm0, %v59_v11  ;;  %989 = vmatmul.msk.f32.gmra.mxu2 %vm64_vm0, %v57_v12  ;;  %v1093_v57 = vld [vmem:[%s1635_s3] ss:$0 sm:$0xff] }
  0x12   :  { %304 = vmatpush.msrb.mxu2 %v267_v53  ;;  %v1024_v53 = vld [vmem:[%s1637_s4 + $0x20] sm:$0xff] }
  0x13   :  { %987 = vmatmul.msk.f32.gmra.mxu1 %vm64_vm0, %v55_v13  ;;  %985 = vmatmul.msk.f32.gmra.mxu0 %vm64_vm0, %v53_v14 }
  0x14   :  { %223 = vperm.xlu0 %1090, %v209_v15   ;;  %233 = vperm.xlu1 %1091, %v211_v17  }
  0x15   :  { %305 = vmatpush.msrb.mxu2 %v266_v54  ;;  %v1094_v54 = vld [vmem:[%s1638_s5] ss:$0 sm:$0xff] }
  0x16   :  { %243 = vperm.xlu2 %1092, %v213_v33  }
  0x17   :  { %306 = vmatpush.msrb.mxu2 %v265_v55 }
  0x19   :  { %307 = vmatpush.msrb.mxu2 %v264_v56 }
  0x1c   :  { %248 = vperm.xlu0 %1090, %v214_v16   ;;  %253 = vperm.xlu1 %1091, %v215_v19  }
  0x1e   :  { %405 = vperm.xlu2 %1092, %v1016_v37  }
  0x24   :  { %410 = vperm.xlu0 %1090, %v1017_v18   ;;  %415 = vperm.xlu1 %1091, %v1018_v21  }
  0x26   :  { %420 = vperm.xlu2 %1092, %v1019_v41  }
  0x2c   :  { %425 = vperm.xlu0 %1090, %v1020_v20   ;;  %430 = vperm.xlu1 %1091, %v1021_v23  }
  0x2e   :  { %435 = vperm.xlu2 %1092, %v1022_v43  }
  0x34   :  { %440 = vperm.xlu0 %1090, %v1023_v22   ;;  %594 = vperm.xlu1 %1091, %v1045_v28  }
  0x36   :  { %599 = vperm.xlu2 %1092, %v1046_v45   ;;  %v1027_v45 = vld [vmem:[%s1637_s4 + $0x38] sm:$0xff] }
  0x37   :  { %492 = vmatpush.msrb.mxu0 %v1027_v45 }
  0x3c   :  { %604 = vperm.xlu0 %1090, %v1047_v24   ;;  %609 = vperm.xlu1 %1091, %v1048_v35  }
  0x3e   :  { %614 = vperm.xlu2 %1092, %v1049_v47   ;;  %v1026_v47 = vld [vmem:[%s1637_s4 + $0x30] sm:$0xff] }
  0x3f   :  { %493 = vmatpush.msrb.mxu0 %v1026_v47 }
  0x44   :  { %619 = vperm.xlu0 %1090, %v1050_v29   ;;  %624 = vperm.xlu1 %1091, %v1051_v39  }
  0x46   :  { %629 = vperm.xlu2 %1092, %v1052_v49   ;;  %v1025_v49 = vld [vmem:[%s1637_s4 + $0x28] sm:$0xff] }
  0x47   :  { %494 = vmatpush.msrb.mxu0 %v1025_v49 }
  0x49   :  { %495 = vmatpush.msrb.mxu0 %v1024_v53 }
  0x68   :  { %v239_v16 = vpop.permute.xlu2 %238 }
  0x70   :  { %v244_v22 = vpop.permute.xlu2 %243 }
  0x7e   :  { %v219_v60 = vpop.permute.xlu0 %218  ;;  %v229_v6 = vpop.permute.xlu1 %228 }
  0x86   :  { %v224_v2 = vpop.permute.xlu0 %223  ;;  %v234_v12 = vpop.permute.xlu1 %233 }
  0x88   :  { %v112_v30 = vpop.f32.mrf.mxu1  ;;  %v106_v32 = vpop.f32.mrf.mxu0 }
  0x8c   :  { %v124_v25 = vpop.f32.mrf.mxu3  ;;  %v118_v26 = vpop.f32.mrf.mxu2 }
  0x8e   :  { %v249_v27 = vpop.permute.xlu0 %248 }
  0x90   :  { %v115_v36 = vpop.f32.mrf.mxu1  ;;  %v109_v38 = vpop.f32.mrf.mxu0 }
  0x94   :  { %v127_v31 = vpop.f32.mrf.mxu3  ;;  %v121_v34 = vpop.f32.mrf.mxu2 }
  0x95   :  { %167 = vmatpush.msrb.mxu1 %v127_v31 }
  0x97   :  { %168 = vmatpush.msrb.mxu1 %v124_v25 }
  0x99   :  { %169 = vmatpush.msrb.mxu1 %v121_v34 }
  0x9b   :  { %170 = vmatpush.msrb.mxu1 %v118_v26 }
  0x9d   :  { %171 = vmatpush.msrb.mxu1 %v115_v36 }
  0x9f   :  { %172 = vmatpush.msrb.mxu1 %v112_v30 }
  0xa1   :  { %173 = vmatpush.msrb.mxu1 %v109_v38 }
  0xa3   :  { %174 = vmatpush.msrb.mxu1 %v106_v32  ;;  %v254_v32 = vpop.permute.xlu1 %253 }
  0xa4   :  { %992 = vmatmul.msk.f32.vlgmr.msrb.gmra.mxu1 %vm134_vm1, %v1306_v40 }
  0xac   :  { %993 = vmatmul.msk.f32.gmra.mxu1 %vm134_vm1, %v1316_v42 }
  0xb4   :  { %994 = vmatmul.msk.f32.gmra.mxu1 %vm134_vm1, %v1326_v44 }
  0xbc   :  { %995 = vmatmul.msk.f32.gmra.mxu1 %vm134_vm1, %v1336_v46 }
  0xc4   :  { %996 = vmatmul.msk.f32.gmra.mxu1 %vm134_vm1, %v1346_v48 }
  0xcc   :  { %997 = vmatmul.msk.f32.gmra.mxu1 %vm134_vm1, %v1356_v50 }
  0xd4   :  { %998 = vmatmul.msk.f32.gmra.mxu1 %vm134_vm1, %v1363_v51 }
  0xdc   :  { %999 = vmatmul.msk.f32.gmra.mxu1 %vm134_vm1, %v1370_v52 }
 0x121   :  { %v176_v58 = vpop.f32.mrf.mxu1 }
 0x122   :  { %v177_v59 = vadd.f32 %v1093_v57, %v176_v58 }
 0x124   :  { %v1389_v61 = vmax.f32 %v177_v59, 0.0  ;;  %v406_v59 = vpop.permute.xlu2 %405 }
 0x126   :  { %v256_v62 = vmul.f32 %v219_v60, %v1389_v61 }
 0x128   :  { %1000 = vmatmul.msk.f32.vlgmr.msrb.gmra.mxu2 %vm64_vm0, %v256_v62 }
 0x129   :  { %v179_v63 = vpop.f32.mrf.mxu1 }
 0x12a   :  { %v180_v0 = vadd.f32 %v1093_v57, %v179_v63 }
 0x12c   :  { %v1393_v1 = vmax.f32 %v180_v0, 0.0 }
 0x12e   :  { %v257_v3 = vmul.f32 %v224_v2, %v1393_v1 }
 0x130   :  { %1001 = vmatmul.msk.f32.gmra.mxu2 %vm64_vm0, %v257_v3  ;;  %v411_v3 = vpop.permute.xlu0 %410 }
 0x131   :  { %v182_v4 = vpop.f32.mrf.mxu1 }
 0x132   :  { %v183_v5 = vadd.f32 %v1093_v57, %v182_v4 }
 0x134   :  { %v1397_v7 = vmax.f32 %v183_v5, 0.0 }
 0x136   :  { %v258_v8 = vmul.f32 %v229_v6, %v1397_v7 }
 0x138   :  { %1002 = vmatmul.msk.f32.gmra.mxu2 %vm64_vm0, %v258_v8 }
 0x139   :  { %v185_v9 = vpop.f32.mrf.mxu1 }
 0x13a   :  { %v186_v10 = vadd.f32 %v1093_v57, %v185_v9 }
 0x13c   :  { %v1401_v11 = vmax.f32 %v186_v10, 0.0  ;;  %v416_v10 = vpop.permute.xlu1 %415 }
 0x13e   :  { %v259_v13 = vmul.f32 %v234_v12, %v1401_v11 }
 0x140   :  { %1003 = vmatmul.msk.f32.gmra.mxu2 %vm64_vm0, %v259_v13 }
 0x141   :  { %v188_v14 = vpop.f32.mrf.mxu1 }
 0x142   :  { %v189_v15 = vadd.f32 %v1093_v57, %v188_v14 }
 0x144   :  { %v1405_v17 = vmax.f32 %v189_v15, 0.0 }
 0x146   :  { %v260_v18 = vmul.f32 %v239_v16, %v1405_v17 }
 0x148   :  { %1004 = vmatmul.msk.f32.gmra.mxu2 %vm64_vm0, %v260_v18  ;;  %v421_v18 = vpop.permute.xlu2 %420 }
 0x149   :  { %v191_v19 = vpop.f32.mrf.mxu1 }
 0x14a   :  { %v192_v20 = vadd.f32 %v1093_v57, %v191_v19 }
 0x14c   :  { %v1409_v21 = vmax.f32 %v192_v20, 0.0 }
 0x14e   :  { %v261_v23 = vmul.f32 %v244_v22, %v1409_v21 }
 0x150   :  { %1005 = vmatmul.msk.f32.gmra.mxu2 %vm64_vm0, %v261_v23 }
 0x151   :  { %v194_v24 = vpop.f32.mrf.mxu1 }
 0x152   :  { %v195_v25 = vadd.f32 %v1093_v57, %v194_v24 }
 0x154   :  { %v1413_v26 = vmax.f32 %v195_v25, 0.0  ;;  %v426_v25 = vpop.permute.xlu0 %425 }
 0x156   :  { %v262_v28 = vmul.f32 %v249_v27, %v1413_v26 }
 0x158   :  { %1006 = vmatmul.msk.f32.gmra.mxu2 %vm64_vm0, %v262_v28 }
 0x159   :  { %v197_v29 = vpop.f32.mrf.mxu1 }
 0x15a   :  { %v198_v30 = vadd.f32 %v1093_v57, %v197_v29 }
 0x15c   :  { %v1417_v31 = vmax.f32 %v198_v30, 0.0  ;;  %v441_v53 = vpop.permute.xlu0 %440 }
 0x15e   :  { %v263_v33 = vmul.f32 %v254_v32, %v1417_v31 }
 0x160   :  { %1007 = vmatmul.msk.f32.gmra.mxu2 %vm64_vm0, %v263_v33  ;;  %v431_v33 = vpop.permute.xlu1 %430 }
 0x1ab   :  { %v309_v34 = vpop.f32.mrf.mxu2 }
 0x1b3   :  { %v312_v35 = vpop.f32.mrf.mxu2 }
 0x1bb   :  { %v315_v36 = vpop.f32.mrf.mxu2 }
 0x1c3   :  { %v318_v37 = vpop.f32.mrf.mxu2 }
 0x1cb   :  { %v321_v38 = vpop.f32.mrf.mxu2 }
 0x1d3   :  { %v324_v39 = vpop.f32.mrf.mxu2 }
 0x1db   :  { %v327_v41 = vpop.f32.mrf.mxu2 }
 0x1e3   :  { %v330_v43 = vpop.f32.mrf.mxu2 }
 0x1e4   :  { %345 = vmatpush.msrb.mxu3 %v330_v43 }
 0x1e6   :  { %346 = vmatpush.msrb.mxu3 %v327_v41 }
 0x1e8   :  { %347 = vmatpush.msrb.mxu3 %v324_v39  ;;  %v436_v39 = vpop.permute.xlu2 %435 }
 0x1ea   :  { %348 = vmatpush.msrb.mxu3 %v321_v38 }
 0x1ec   :  { %349 = vmatpush.msrb.mxu3 %v318_v37 }
 0x1ee   :  { %350 = vmatpush.msrb.mxu3 %v315_v36 }
 0x1f0   :  { %351 = vmatpush.msrb.mxu3 %v312_v35 }
 0x1f2   :  { %352 = vmatpush.msrb.mxu3 %v309_v34 }
 0x1f3   :  { %1008 = vmatmul.msk.f32.vlgmr.msrb.gmra.mxu3 %vm134_vm1, %v1306_v40 }
 0x1fb   :  { %1009 = vmatmul.msk.f32.gmra.mxu3 %vm134_vm1, %v1316_v42 }
 0x203   :  { %1010 = vmatmul.msk.f32.gmra.mxu3 %vm134_vm1, %v1326_v44 }
 0x20b   :  { %1011 = vmatmul.msk.f32.gmra.mxu3 %vm134_vm1, %v1336_v46 }
 0x213   :  { %1012 = vmatmul.msk.f32.gmra.mxu3 %vm134_vm1, %v1346_v48 }
 0x21b   :  { %1013 = vmatmul.msk.f32.gmra.mxu3 %vm134_vm1, %v1356_v50 }
 0x223   :  { %1014 = vmatmul.msk.f32.gmra.mxu3 %vm134_vm1, %v1363_v51 }
 0x22b   :  { %1015 = vmatmul.msk.f32.gmra.mxu3 %vm134_vm1, %v1370_v52 }
 0x276   :  { %v354_v55 = vpop.f32.mrf.mxu3 }
 0x277   :  { %v355_v56 = vadd.f32 %v1094_v54, %v354_v55 }
 0x279   :  { %v378_v57 = vadd.f32 %v355_v56, %v1389_v61 }
 0x27b   :  { %v386_v58 = vmax.f32 %v378_v57, 0.0 }
 0x27d   :  { %v443_v60 = vmul.f32 %v406_v59, %v386_v58 }
 0x27e   :  { %v357_v62 = vpop.f32.mrf.mxu3 }
 0x27f   :  { %v358_v63 = vadd.f32 %v1094_v54, %v357_v62  ;;  %1028 = vmatmul.msk.f32.vlgmr.msrb.gmra.mxu0 %vm64_vm0, %v443_v60 }
 0x281   :  { %v379_v0 = vadd.f32 %v358_v63, %v1393_v1 }
 0x283   :  { %v387_v2 = vmax.f32 %v379_v0, 0.0 }
 0x285   :  { %v444_v4 = vmul.f32 %v411_v3, %v387_v2  ;;  %v595_v2 = vpop.permute.xlu1 %594 }
 0x286   :  { %v360_v5 = vpop.f32.mrf.mxu3 }
 0x287   :  { %v361_v6 = vadd.f32 %v1094_v54, %v360_v5  ;;  %1029 = vmatmul.msk.f32.gmra.mxu0 %vm64_vm0, %v444_v4 }
 0x289   :  { %v380_v8 = vadd.f32 %v361_v6, %v1397_v7 }
 0x28b   :  { %v388_v9 = vmax.f32 %v380_v8, 0.0 }
 0x28d   :  { %v445_v12 = vmul.f32 %v416_v10, %v388_v9  ;;  %v600_v9 = vpop.permute.xlu2 %599 }
 0x28e   :  { %v363_v13 = vpop.f32.mrf.mxu3 }
 0x28f   :  { %v364_v14 = vadd.f32 %v1094_v54, %v363_v13  ;;  %1030 = vmatmul.msk.f32.gmra.mxu0 %vm64_vm0, %v445_v12 }
 0x291   :  { %v381_v15 = vadd.f32 %v364_v14, %v1401_v11 }
 0x293   :  { %v389_v16 = vmax.f32 %v381_v15, 0.0 }
 0x295   :  { %v446_v19 = vmul.f32 %v421_v18, %v389_v16 }
 0x296   :  { %v366_v20 = vpop.f32.mrf.mxu3 }
 0x297   :  { %v367_v22 = vadd.f32 %v1094_v54, %v366_v20  ;;  %1031 = vmatmul.msk.f32.gmra.mxu0 %vm64_vm0, %v446_v19 }
 0x299   :  { %v382_v23 = vadd.f32 %v367_v22, %v1405_v17 }
 0x29b   :  { %v390_v24 = vmax.f32 %v382_v23, 0.0 }
 0x29d   :  { %v447_v27 = vmul.f32 %v426_v25, %v390_v24 }
 0x29e   :  { %v369_v28 = vpop.f32.mrf.mxu3 }
 0x29f   :  { %v370_v29 = vadd.f32 %v1094_v54, %v369_v28  ;;  %1032 = vmatmul.msk.f32.gmra.mxu0 %vm64_vm0, %v447_v27 }
 0x2a1   :  { %v383_v30 = vadd.f32 %v370_v29, %v1409_v21  ;;  %v615_v29 = vpop.permute.xlu2 %614 }
 0x2a3   :  { %v391_v32 = vmax.f32 %v383_v30, 0.0 }
 0x2a5   :  { %v448_v34 = vmul.f32 %v431_v33, %v391_v32 }
 0x2a6   :  { %v372_v35 = vpop.f32.mrf.mxu3 }
 0x2a7   :  { %v373_v36 = vadd.f32 %v1094_v54, %v372_v35  ;;  %1033 = vmatmul.msk.f32.gmra.mxu0 %vm64_vm0, %v448_v34 }
 0x2a9   :  { %v384_v37 = vadd.f32 %v373_v36, %v1413_v26 }
 0x2ab   :  { %v392_v38 = vmax.f32 %v384_v37, 0.0 }
 0x2ad   :  { %v449_v41 = vmul.f32 %v436_v39, %v392_v38 }
 0x2ae   :  { %v375_v43 = vpop.f32.mrf.mxu3 }
 0x2af   :  { %v376_v45 = vadd.f32 %v1094_v54, %v375_v43  ;;  %1034 = vmatmul.msk.f32.gmra.mxu0 %vm64_vm0, %v449_v41  ;;  %v643_v54 = vld [vmem:[%s1639_s7 + $0x18] sm:$0xff] }
 0x2b0   :  { %684 = vmatpush.msra.mxu1 %v643_v54 }
 0x2b1   :  { %v385_v47 = vadd.f32 %v376_v45, %v1417_v31 }
 0x2b3   :  { %v393_v49 = vmax.f32 %v385_v47, 0.0 }
 0x2b5   :  { %v450_v55 = vmul.f32 %v441_v53, %v393_v49 }
 0x2b7   :  { %1035 = vmatmul.msk.f32.gmra.mxu0 %vm64_vm0, %v450_v55 }
 0x2fc   :  { %v497_v56 = vpop.f32.mrf.mxu0 }
 0x304   :  { %v500_v57 = vpop.f32.mrf.mxu0 }
 0x30c   :  { %v503_v58 = vpop.f32.mrf.mxu0 }
 0x314   :  { %v506_v59 = vpop.f32.mrf.mxu0 }
 0x31c   :  { %v509_v60 = vpop.f32.mrf.mxu0 }
 0x324   :  { %v512_v62 = vpop.f32.mrf.mxu0 }
 0x32c   :  { %v515_v63 = vpop.f32.mrf.mxu0 }
 0x334   :  { %v518_v0 = vpop.f32.mrf.mxu0 }
 0x335   :  { %534 = vmatpush.msra.mxu2 %v518_v0 }
 0x337   :  { %535 = vmatpush.msra.mxu2 %v515_v63 }
 0x339   :  { %536 = vmatpush.msra.mxu2 %v512_v62 }
 0x33b   :  { %537 = vmatpush.msra.mxu2 %v509_v60 }
 0x33d   :  { %538 = vmatpush.msra.mxu2 %v506_v59 }
 0x33f   :  { %539 = vmatpush.msra.mxu2 %v503_v58 }
 0x341   :  { %540 = vmatpush.msra.mxu2 %v500_v57  ;;  %v721_v57 = vld [vmem:[%s1641_s9] sm:$0xff] }
 0x343   :  { %541 = vmatpush.msra.mxu2 %v497_v56  ;;  %v723_v56 = vld [vmem:[%s1641_s9 + $0x10] sm:$0xff] }
 0x344   :  { %1037 = vmatmul.msk.f32.vlgmr.msra.gmra.mxu2 %vm134_vm1, %v1306_v40  ;;  %v642_v40 = vld [vmem:[%s1639_s7 + $0x10] sm:$0xff] }
 0x345   :  { %685 = vmatpush.msra.mxu1 %v642_v40 }
 0x34c   :  { %1038 = vmatmul.msk.f32.gmra.mxu2 %vm134_vm1, %v1316_v42  ;;  %v641_v42 = vld [vmem:[%s1639_s7 + $0x8] sm:$0xff] }
 0x34d   :  { %686 = vmatpush.msra.mxu1 %v641_v42 }
 0x354   :  { %1039 = vmatmul.msk.f32.gmra.mxu2 %vm134_vm1, %v1326_v44  ;;  %v640_v44 = vld [vmem:[%s1639_s7] sm:$0xff] }
 0x355   :  { %687 = vmatpush.msra.mxu1 %v640_v44 }
 0x35c   :  { %1040 = vmatmul.msk.f32.gmra.mxu2 %vm134_vm1, %v1336_v46  ;;  %v1095_v46 = vld [vmem:[%s1638_s5 + $0x1] ss:$0 sm:$0xff] }
 0x364   :  { %1041 = vmatmul.msk.f32.gmra.mxu2 %vm134_vm1, %v1346_v48 }
 0x36c   :  { %1042 = vmatmul.msk.f32.gmra.mxu2 %vm134_vm1, %v1356_v50 }
 0x374   :  { %1043 = vmatmul.msk.f32.gmra.mxu2 %vm134_vm1, %v1363_v51 }
 0x37c   :  { %1044 = vmatmul.msk.f32.gmra.mxu2 %vm134_vm1, %v1370_v52 }
 0x3c7   :  { %v543_v48 = vpop.f32.mrf.mxu2 }
 0x3c8   :  { %v544_v50 = vadd.f32 %v1095_v46, %v543_v48 }
 0x3ca   :  { %v567_v51 = vadd.f32 %v544_v50, %v1389_v61  ;;  %v605_v61 = vpop.permute.xlu0 %604  ;;  %v805_v50 = vld [vmem:[%s1643_s11 + $0x18] sm:$0xff] }
 0x3cb   :  { %846 = vmatpush.msra.mxu0 %v805_v50 }
 0x3cc   :  { %v575_v52 = vmax.f32 %v567_v51, 0.0 }
 0x3ce   :  { %v632_v3 = vmul.f32 %v595_v2, %v575_v52 }
 0x3cf   :  { %v546_v4 = vpop.f32.mrf.mxu2 }
 0x3d0   :  { %v547_v5 = vadd.f32 %v1095_v46, %v546_v4  ;;  %1053 = vmatmul.msk.f32.vlgmr.msra.gmra.mxu1 %vm64_vm0, %v632_v3 }
 0x3d2   :  { %v568_v6 = vadd.f32 %v547_v5, %v1393_v1  ;;  %v610_v1 = vpop.permute.xlu1 %609  ;;  %v620_v35 = vpop.permute.xlu0 %619 }
 0x3d4   :  { %v576_v8 = vmax.f32 %v568_v6, 0.0 }
 0x3d6   :  { %v633_v10 = vmul.f32 %v600_v9, %v576_v8 }
 0x3d7   :  { %v549_v12 = vpop.f32.mrf.mxu2 }
 0x3d8   :  { %v550_v13 = vadd.f32 %v1095_v46, %v549_v12  ;;  %1054 = vmatmul.msk.f32.gmra.mxu1 %vm64_vm0, %v633_v10 }
 0x3da   :  { %v569_v14 = vadd.f32 %v550_v13, %v1397_v7  ;;  %v724_v7 = vld [vmem:[%s1641_s9 + $0x18] sm:$0xff] }
 0x3db   :  { %765 = vmatpush.msra.mxu3 %v724_v7 }
 0x3dc   :  { %v577_v15 = vmax.f32 %v569_v14, 0.0  ;;  %v804_v14 = vld [vmem:[%s1643_s11 + $0x10] sm:$0xff] }
 0x3dd   :  { %766 = vmatpush.msra.mxu3 %v723_v56  ;;  %847 = vmatpush.msra.mxu0 %v804_v14 }
 0x3de   :  { %v634_v16 = vmul.f32 %v605_v61, %v577_v15  ;;  %v803_v15 = vld [vmem:[%s1643_s11 + $0x8] sm:$0xff]  ;;  %v802_v61 = vld [vmem:[%s1643_s11] sm:$0xff] }
 0x3df   :  { %v552_v18 = vpop.f32.mrf.mxu2  ;;  %848 = vmatpush.msra.mxu0 %v803_v15 }
 0x3e0   :  { %v553_v19 = vadd.f32 %v1095_v46, %v552_v18  ;;  %1055 = vmatmul.msk.f32.gmra.mxu1 %vm64_vm0, %v634_v16  ;;  %v1097_v16 = vld [vmem:[%s1642_s10] ss:$0 sm:$0xff] }
 0x3e1   :  { %849 = vmatpush.msra.mxu0 %v802_v61 }
 0x3e2   :  { %v570_v20 = vadd.f32 %v553_v19, %v1401_v11 }
 0x3e4   :  { %v578_v22 = vmax.f32 %v570_v20, 0.0 }
 0x3e6   :  { %v635_v23 = vmul.f32 %v610_v1, %v578_v22 }
 0x3e7   :  { %v555_v24 = vpop.f32.mrf.mxu2 }
 0x3e8   :  { %v556_v25 = vadd.f32 %v1095_v46, %v555_v24  ;;  %1056 = vmatmul.msk.f32.gmra.mxu1 %vm64_vm0, %v635_v23 }
 0x3ea   :  { %v571_v27 = vadd.f32 %v556_v25, %v1405_v17  ;;  %v625_v17 = vpop.permute.xlu1 %624 }
 0x3ec   :  { %v579_v28 = vmax.f32 %v571_v27, 0.0 }
 0x3ee   :  { %v636_v30 = vmul.f32 %v615_v29, %v579_v28 }
 0x3ef   :  { %v558_v32 = vpop.f32.mrf.mxu2 }
 0x3f0   :  { %v559_v33 = vadd.f32 %v1095_v46, %v558_v32  ;;  %1057 = vmatmul.msk.f32.gmra.mxu1 %vm64_vm0, %v636_v30 }
 0x3f2   :  { %v572_v11 = vadd.f32 %v559_v33, %v1409_v21  ;;  %v630_v21 = vpop.permute.xlu2 %629 }
 0x3f4   :  { %v580_v34 = vmax.f32 %v572_v11, 0.0 }
 0x3f6   :  { %v637_v36 = vmul.f32 %v620_v35, %v580_v34 }
 0x3f7   :  { %v561_v37 = vpop.f32.mrf.mxu2 }
 0x3f8   :  { %v562_v38 = vadd.f32 %v1095_v46, %v561_v37  ;;  %1058 = vmatmul.msk.f32.gmra.mxu1 %vm64_vm0, %v637_v36 }
 0x3fa   :  { %v573_v39 = vadd.f32 %v562_v38, %v1413_v26  ;;  %v722_v26 = vld [vmem:[%s1641_s9 + $0x8] sm:$0xff] }
 0x3fb   :  { %767 = vmatpush.msra.mxu3 %v722_v26 }
 0x3fc   :  { %v581_v41 = vmax.f32 %v573_v39, 0.0 }
 0x3fd   :  { %768 = vmatpush.msra.mxu3 %v721_v57 }
 0x3fe   :  { %v638_v43 = vmul.f32 %v625_v17, %v581_v41 }
 0x3ff   :  { %v564_v45 = vpop.f32.mrf.mxu2 }
 0x400   :  { %v565_v47 = vadd.f32 %v1095_v46, %v564_v45  ;;  %1059 = vmatmul.msk.f32.gmra.mxu1 %vm64_vm0, %v638_v43  ;;  %v1098_v43 = vld [vmem:[%s1644_s12] ss:$0 sm:$0xff] }
 0x402   :  { %v574_v49 = vadd.f32 %v565_v47, %v1417_v31  ;;  %v1096_v31 = vld [vmem:[%s1640_s8] ss:$0 sm:$0xff] }
 0x404   :  { %v582_v53 = vmax.f32 %v574_v49, 0.0 }
 0x406   :  { %v639_v55 = vmul.f32 %v630_v21, %v582_v53 }
 0x408   :  { %1060 = vmatmul.msk.f32.gmra.mxu1 %vm64_vm0, %v639_v55 }
 0x44d   :  { %v689_v58 = vpop.f32.mrf.mxu1 }
 0x44e   :  { %v690_v59 = vadd.f32 %v1096_v31, %v689_v58 }
 0x450   :  { %v713_v60 = vmax.f32 %v690_v59, 0.0 }
 0x452   :  { %1061 = vmatmul.msk.f32.vlgmr.msra.gmra.mxu3 %vm64_vm0, %v713_v60 }
 0x455   :  { %v692_v62 = vpop.f32.mrf.mxu1 }
 0x456   :  { %v693_v63 = vadd.f32 %v1096_v31, %v692_v62 }
 0x458   :  { %v714_v0 = vmax.f32 %v693_v63, 0.0 }
 0x45a   :  { %1062 = vmatmul.msk.f32.gmra.mxu3 %vm64_vm0, %v714_v0 }
 0x45d   :  { %v695_v54 = vpop.f32.mrf.mxu1 }
 0x45e   :  { %v696_v40 = vadd.f32 %v1096_v31, %v695_v54 }
 0x460   :  { %v715_v42 = vmax.f32 %v696_v40, 0.0 }
 0x462   :  { %1063 = vmatmul.msk.f32.gmra.mxu3 %vm64_vm0, %v715_v42 }
 0x465   :  { %v698_v44 = vpop.f32.mrf.mxu1 }
 0x466   :  { %v699_v46 = vadd.f32 %v1096_v31, %v698_v44 }
 0x468   :  { %v716_v48 = vmax.f32 %v699_v46, 0.0 }
 0x46a   :  { %1064 = vmatmul.msk.f32.gmra.mxu3 %vm64_vm0, %v716_v48 }
 0x46d   :  { %v701_v51 = vpop.f32.mrf.mxu1 }
 0x46e   :  { %v702_v52 = vadd.f32 %v1096_v31, %v701_v51 }
 0x470   :  { %v717_v2 = vmax.f32 %v702_v52, 0.0 }
 0x472   :  { %1065 = vmatmul.msk.f32.gmra.mxu3 %vm64_vm0, %v717_v2 }
 0x475   :  { %v704_v3 = vpop.f32.mrf.mxu1 }
 0x476   :  { %v705_v4 = vadd.f32 %v1096_v31, %v704_v3 }
 0x478   :  { %v718_v5 = vmax.f32 %v705_v4, 0.0 }
 0x47a   :  { %1066 = vmatmul.msk.f32.gmra.mxu3 %vm64_vm0, %v718_v5 }
 0x47d   :  { %v707_v6 = vpop.f32.mrf.mxu1 }
 0x47e   :  { %v708_v8 = vadd.f32 %v1096_v31, %v707_v6 }
 0x480   :  { %v719_v9 = vmax.f32 %v708_v8, 0.0 }
 0x482   :  { %1067 = vmatmul.msk.f32.gmra.mxu3 %vm64_vm0, %v719_v9 }
 0x485   :  { %v710_v10 = vpop.f32.mrf.mxu1 }
 0x486   :  { %v711_v12 = vadd.f32 %v1096_v31, %v710_v10 }
 0x488   :  { %v720_v13 = vmax.f32 %v711_v12, 0.0 }
 0x48a   :  { %1068 = vmatmul.msk.f32.gmra.mxu3 %vm64_vm0, %v720_v13 }
 0x4d5   :  { %v770_v18 = vpop.f32.mrf.mxu3 }
 0x4d6   :  { %v771_v19 = vadd.f32 %v1097_v16, %v770_v18 }
 0x4d8   :  { %v794_v20 = vmax.f32 %v771_v19, 0.0 }
 0x4da   :  { %1069 = vmatmul.msk.f32.vlgmr.msra.gmra.mxu0 %vm64_vm0, %v794_v20 }
 0x4dd   :  { %v773_v22 = vpop.f32.mrf.mxu3 }
 0x4de   :  { %v774_v1 = vadd.f32 %v1097_v16, %v773_v22 }
 0x4e0   :  { %v795_v23 = vmax.f32 %v774_v1, 0.0 }
 0x4e2   :  { %1070 = vmatmul.msk.f32.gmra.mxu0 %vm64_vm0, %v795_v23 }
 0x4e5   :  { %v776_v24 = vpop.f32.mrf.mxu3 }
 0x4e6   :  { %v777_v25 = vadd.f32 %v1097_v16, %v776_v24 }
 0x4e8   :  { %v796_v7 = vmax.f32 %v777_v25, 0.0 }
 0x4ea   :  { %1071 = vmatmul.msk.f32.gmra.mxu0 %vm64_vm0, %v796_v7 }
 0x4ed   :  { %v779_v27 = vpop.f32.mrf.mxu3 }
 0x4ee   :  { %v780_v28 = vadd.f32 %v1097_v16, %v779_v27 }
 0x4f0   :  { %v797_v29 = vmax.f32 %v780_v28, 0.0 }
 0x4f2   :  { %1072 = vmatmul.msk.f32.gmra.mxu0 %vm64_vm0, %v797_v29 }
 0x4f5   :  { %v782_v30 = vpop.f32.mrf.mxu3 }
 0x4f6   :  { %v783_v32 = vadd.f32 %v1097_v16, %v782_v30 }
 0x4f8   :  { %v798_v33 = vmax.f32 %v783_v32, 0.0 }
 0x4fa   :  { %1073 = vmatmul.msk.f32.gmra.mxu0 %vm64_vm0, %v798_v33 }
 0x4fd   :  { %v785_v11 = vpop.f32.mrf.mxu3 }
 0x4fe   :  { %v786_v34 = vadd.f32 %v1097_v16, %v785_v11 }
 0x500   :  { %v799_v35 = vmax.f32 %v786_v34, 0.0 }
 0x502   :  { %1074 = vmatmul.msk.f32.gmra.mxu0 %vm64_vm0, %v799_v35 }
 0x505   :  { %v788_v36 = vpop.f32.mrf.mxu3 }
 0x506   :  { %v789_v37 = vadd.f32 %v1097_v16, %v788_v36 }
 0x508   :  { %v800_v38 = vmax.f32 %v789_v37, 0.0 }
 0x50a   :  { %1075 = vmatmul.msk.f32.gmra.mxu0 %vm64_vm0, %v800_v38 }
 0x50d   :  { %v791_v39 = vpop.f32.mrf.mxu3 }
 0x50e   :  { %v792_v41 = vadd.f32 %v1097_v16, %v791_v39 }
 0x510   :  { %v801_v17 = vmax.f32 %v792_v41, 0.0 }
 0x512   :  { %1076 = vmatmul.msk.f32.gmra.mxu0 %vm64_vm0, %v801_v17 }
 0x557   :  { %v851_v45 = vpop.f32.mrf.mxu0 }
 0x558   :  { %v852_v47 = vadd.f32 %v1098_v43, %v851_v45 }
 0x55a   :  { %v876_v49 = vsel %vm875_vm2, %v852_v47, -inf }
 0x55b   :  { %877 = vmax.xlane.f32.xlu0 %v876_v49 }
 0x55f   :  { %v854_v53 = vpop.f32.mrf.mxu0 }
 0x560   :  { %v855_v21 = vadd.f32 %v1098_v43, %v854_v53 }
 0x562   :  { %v879_v55 = vsel %vm875_vm2, %v855_v21, -inf }
 0x563   :  { %880 = vmax.xlane.f32.xlu1 %v879_v55 }
 0x567   :  { %v857_v56 = vpop.f32.mrf.mxu0 }
 0x568   :  { %v858_v26 = vadd.f32 %v1098_v43, %v857_v56 }
 0x56a   :  { %v882_v57 = vsel %vm875_vm2, %v858_v26, -inf }
 0x56b   :  { %883 = vmax.xlane.f32.xlu2 %v882_v57 }
 0x56f   :  { %v860_v31 = vpop.f32.mrf.mxu0 }
 0x570   :  { %v861_v58 = vadd.f32 %v1098_v43, %v860_v31 }
 0x572   :  { %v885_v59 = vsel %vm875_vm2, %v861_v58, -inf }
 0x573   :  { %886 = vmax.xlane.f32.xlu2 %v885_v59 }
 0x577   :  { %v863_v60 = vpop.f32.mrf.mxu0 }
 0x578   :  { %v864_v62 = vadd.f32 %v1098_v43, %v863_v60 }
 0x57a   :  { %v888_v63 = vsel %vm875_vm2, %v864_v62, -inf }
 0x57b   :  { %889 = vmax.xlane.f32.xlu0 %v888_v63 }
 0x57f   :  { %v866_v0 = vpop.f32.mrf.mxu0 }
 0x580   :  { %v867_v54 = vadd.f32 %v1098_v43, %v866_v0 }
 0x582   :  { %v891_v40 = vsel %vm875_vm2, %v867_v54, -inf }
 0x583   :  { %892 = vmax.xlane.f32.xlu1 %v891_v40 }
 0x587   :  { %v869_v42 = vpop.f32.mrf.mxu0 }
 0x588   :  { %v870_v44 = vadd.f32 %v1098_v43, %v869_v42 }
 0x58a   :  { %v894_v46 = vsel %vm875_vm2, %v870_v44, -inf }
 0x58b   :  { %895 = vmax.xlane.f32.xlu2 %v894_v46 }
 0x58f   :  { %v872_v48 = vpop.f32.mrf.mxu0 }
 0x590   :  { %v873_v50 = vadd.f32 %v1098_v43, %v872_v48 }
 0x592   :  { %v897_v51 = vsel %vm875_vm2, %v873_v50, -inf }
 0x593   :  { %898 = vmax.xlane.f32.xlu0 %v897_v51 }
 0x5ce   :  { %v878_v52 = vpop.xlane.xlu0 %877 }
 0x5cf   :  { %v1572_v2 = vsub.f32 %v852_v47, %v878_v52 }
 0x5d1   :  { %v908_v3 = vmul.f32 1.442695, %v1572_v2 }
 0x5d3   :  { %1099 = vpow2.f32 %v908_v3 }
 0x5d6   :  { %v881_v4 = vpop.xlane.xlu1 %880 }
 0x5d7   :  { %v1575_v5 = vsub.f32 %v855_v21, %v881_v4 }
 0x5d9   :  { %v1100_v6 = vpop.eup %1099  ;;  %v910_v8 = vmul.f32 1.442695, %v1575_v5 }
 0x5da   :  { %v924_v9 = vsel %vm875_vm2, %v1100_v6, 0.0 }
 0x5db   :  { %1101 = vpow2.f32 %v910_v8  ;;  %925 = vadd.xlane.f32.xlu1 %v924_v9 }
 0x5de   :  { %v884_v10 = vpop.xlane.xlu2 %883 }
 0x5df   :  { %v1579_v12 = vsub.f32 %v858_v26, %v884_v10 }
 0x5e1   :  { %v1102_v13 = vpop.eup %1101  ;;  %v912_v14 = vmul.f32 1.442695, %v1579_v12 }
 0x5e2   :  { %v927_v15 = vsel %vm875_vm2, %v1102_v13, 0.0 }
 0x5e3   :  { %1103 = vpow2.f32 %v912_v14  ;;  %928 = vadd.xlane.f32.xlu2 %v927_v15 }
 0x5e6   :  { %v887_v61 = vpop.xlane.xlu2 %886 }
 0x5e7   :  { %v1583_v16 = vsub.f32 %v861_v58, %v887_v61 }
 0x5e9   :  { %v1104_v18 = vpop.eup %1103  ;;  %v914_v19 = vmul.f32 1.442695, %v1583_v16 }
 0x5ea   :  { %v930_v20 = vsel %vm875_vm2, %v1104_v18, 0.0 }
 0x5eb   :  { %1105 = vpow2.f32 %v914_v19  ;;  %931 = vadd.xlane.f32.xlu0 %v930_v20 }
 0x5ee   :  { %v890_v22 = vpop.xlane.xlu0 %889 }
 0x5ef   :  { %v1587_v1 = vsub.f32 %v864_v62, %v890_v22 }
 0x5f1   :  { %v1106_v23 = vpop.eup %1105  ;;  %v916_v24 = vmul.f32 1.442695, %v1587_v1 }
 0x5f2   :  { %v933_v25 = vsel %vm875_vm2, %v1106_v23, 0.0 }
 0x5f3   :  { %1107 = vpow2.f32 %v916_v24  ;;  %934 = vadd.xlane.f32.xlu1 %v933_v25 }
 0x5f6   :  { %v893_v7 = vpop.xlane.xlu1 %892 }
 0x5f7   :  { %v905_v27 = vsub.f32 %v867_v54, %v893_v7 }
 0x5f9   :  { %v1108_v28 = vpop.eup %1107  ;;  %v918_v29 = vmul.f32 1.442695, %v905_v27 }
 0x5fa   :  { %v936_v30 = vsel %vm875_vm2, %v1108_v28, 0.0 }
 0x5fb   :  { %1109 = vpow2.f32 %v918_v29  ;;  %937 = vadd.xlane.f32.xlu2 %v936_v30 }
 0x5fe   :  { %v896_v32 = vpop.xlane.xlu2 %895 }
 0x5ff   :  { %v906_v33 = vsub.f32 %v870_v44, %v896_v32 }
 0x601   :  { %v1110_v11 = vpop.eup %1109  ;;  %v920_v34 = vmul.f32 1.442695, %v906_v33 }
 0x602   :  { %v939_v35 = vsel %vm875_vm2, %v1110_v11, 0.0 }
 0x603   :  { %1111 = vpow2.f32 %v920_v34  ;;  %940 = vadd.xlane.f32.xlu0 %v939_v35 }
 0x606   :  { %v899_v36 = vpop.xlane.xlu0 %898 }
 0x607   :  { %v907_v37 = vsub.f32 %v873_v50, %v899_v36 }
 0x609   :  { %v1112_v38 = vpop.eup %1111  ;;  %v922_v39 = vmul.f32 1.442695, %v907_v37 }
 0x60a   :  { %v942_v41 = vsel %vm875_vm2, %v1112_v38, 0.0 }
 0x60b   :  { %1113 = vpow2.f32 %v922_v39  ;;  %943 = vadd.xlane.f32.xlu1 %v942_v41 }
 0x611   :  { %v1114_v17 = vpop.eup %1113 }
 0x612   :  { %v945_v43 = vsel %vm875_vm2, %v1114_v17, 0.0 }
 0x613   :  { %946 = vadd.xlane.f32.xlu2 %v945_v43 }
 0x64e   :  { %v926_v45 = vpop.xlane.xlu1 %925 }
 0x64f   :  { %1115 = vlog2.f32 %v926_v45 }
 0x655   :  { %v1116_v47 = vpop.eup %1115 }
 0x656   :  { %v949_v49 = vmul.f32 0.6931472, %v1116_v47  ;;  %v929_v53 = vpop.xlane.xlu2 %928 }
 0x657   :  { %1117 = vlog2.f32 %v929_v53 }
 0x658   :  { %v964_v21 = vsub.f32 %v1572_v2, %v949_v49 }
 0x65a   :  { %972 = vst.msk [vmem:[%s1645_s13] sm:$0xff] %vm875_vm2, %v964_v21 }
 0x65d   :  { %v1118_v55 = vpop.eup %1117 }
 0x65e   :  { %v951_v56 = vmul.f32 0.6931472, %v1118_v55  ;;  %v932_v26 = vpop.xlane.xlu0 %931 }
 0x65f   :  { %1119 = vlog2.f32 %v932_v26 }
 0x660   :  { %v965_v57 = vsub.f32 %v1575_v5, %v951_v56 }
 0x662   :  { %973 = vst.msk [vmem:[%s1645_s13 + $0x8] sm:$0xff] %vm875_vm2, %v965_v57 }
 0x665   :  { %v1120_v31 = vpop.eup %1119 }
 0x666   :  { %v953_v58 = vmul.f32 0.6931472, %v1120_v31  ;;  %v935_v59 = vpop.xlane.xlu1 %934 }
 0x667   :  { %1121 = vlog2.f32 %v935_v59 }
 0x668   :  { %v966_v60 = vsub.f32 %v1579_v12, %v953_v58 }
 0x66a   :  { %974 = vst.msk [vmem:[%s1645_s13 + $0x10] sm:$0xff] %vm875_vm2, %v966_v60 }
 0x66d   :  { %v1122_v62 = vpop.eup %1121 }
 0x66e   :  { %v955_v63 = vmul.f32 0.6931472, %v1122_v62  ;;  %v938_v0 = vpop.xlane.xlu2 %937 }
 0x66f   :  { %1123 = vlog2.f32 %v938_v0 }
 0x670   :  { %v967_v54 = vsub.f32 %v1583_v16, %v955_v63 }
 0x672   :  { %975 = vst.msk [vmem:[%s1645_s13 + $0x18] sm:$0xff] %vm875_vm2, %v967_v54 }
 0x675   :  { %v1124_v40 = vpop.eup %1123 }
 0x676   :  { %v957_v42 = vmul.f32 0.6931472, %v1124_v40  ;;  %v941_v44 = vpop.xlane.xlu0 %940 }
 0x677   :  { %1125 = vlog2.f32 %v941_v44 }
 0x678   :  { %v968_v46 = vsub.f32 %v1587_v1, %v957_v42 }
 0x67a   :  { %976 = vst.msk [vmem:[%s1645_s13 + $0x20] sm:$0xff] %vm875_vm2, %v968_v46 }
 0x67d   :  { %v1126_v48 = vpop.eup %1125 }
 0x67e   :  { %v959_v50 = vmul.f32 0.6931472, %v1126_v48  ;;  %v944_v51 = vpop.xlane.xlu1 %943 }
 0x67f   :  { %1127 = vlog2.f32 %v944_v51 }
 0x680   :  { %v969_v52 = vsub.f32 %v905_v27, %v959_v50 }
 0x682   :  { %977 = vst.msk [vmem:[%s1645_s13 + $0x28] sm:$0xff] %vm875_vm2, %v969_v52 }
 0x685   :  { %v1128_v2 = vpop.eup %1127 }
 0x686   :  { %v961_v3 = vmul.f32 0.6931472, %v1128_v2  ;;  %v947_v4 = vpop.xlane.xlu2 %946 }
 0x687   :  { %1129 = vlog2.f32 %v947_v4 }
 0x688   :  { %v970_v5 = vsub.f32 %v906_v33, %v961_v3 }
 0x68a   :  { %978 = vst.msk [vmem:[%s1645_s13 + $0x30] sm:$0xff] %vm875_vm2, %v970_v5 }
 0x68d   :  { %v1130_v6 = vpop.eup %1129 }
 0x68e   :  { %v963_v8 = vmul.f32 0.6931472, %v1130_v6 }
 0x690   :  { %v971_v9 = vsub.f32 %v907_v37, %v963_v8 }
 0x692   :  { %979 = vst.msk [vmem:[%s1645_s13 + $0x38] sm:$0xff] %vm875_vm2, %v971_v9 }

</bundles_post_ra>
